<compile_context>
chip_gen: v7x
topology: tpu7x:2x2x1
jax: 0.10.0
libtpu: 0.0.40
codegen_flags: <defaults>
</compile_context>

<pallas_src>
import jax
import jax.numpy as jnp
from jax import lax
from jax.experimental import pallas as pl
from jax.experimental.pallas import tpu as pltpu


def _round_up(x: int, m: int) -> int:
    return (x + m - 1) // m * m


def make_mlp_kernel(num_layers: int, precision):
    """Fused MLP kernel. Refs: (x, w0, b0, w1, b1, ..., out).

    ReLU between linears, none after the last one (matches
    nn.Sequential(Linear, ReLU, Linear, ..., Linear)).
    """

    def kernel(*refs):
        x_ref = refs[0]
        out_ref = refs[-1]
        h = x_ref[...]
        for i in range(num_layers):
            w_ref = refs[1 + 2 * i]          # (in_i, out_i_pad), VMEM-resident
            b_ref = refs[2 + 2 * i]          # (1, out_i_pad),   VMEM-resident
            # Feed the MXU in the weight's native dtype, accumulate in f32.
            h = jnp.dot(h.astype(w_ref.dtype), w_ref[...],
                        preferred_element_type=jnp.float32,
                        precision=precision)
            h = h + b_ref[...].astype(jnp.float32)   # f32 epilogue (v5e-safe)
            if i < num_layers - 1:
                h = jnp.maximum(h, 0.0)
        out_ref[...] = h.astype(out_ref.dtype)

    return kernel


class PallasMLP:
    """BaseModel forward pass as a single fused Pallas kernel.

    weights: list of (in_dim_i, out_dim_i) arrays (transposed vs torch Linear)
    biases:  list of (out_dim_i,) arrays
    """

    def __init__(self, weights, biases, *, tm_max: int = 1024,
                 param_dtype=None, single_buffer_weights: bool = False,
                 precision=lax.Precision.HIGHEST):
        assert len(weights) == len(biases) >= 1
        self.num_layers = len(weights)
        self.in_dim = int(weights[0].shape[0])
        self.out_dims = [int(w.shape[1]) for w in weights]
        self.tm_max = max(8, _round_up(int(tm_max), 8))
        self.precision = precision
        self.single_buffer_weights = single_buffer_weights

        # ---- one-time parameter padding (hoisted out of the call path) -----
        # pdims[0] = raw input dim (x streams unpadded); pdims[i>=1] = hidden /
        # output dims rounded up to 128 lanes (lane-dense, unmasked stores).
        self.pdims = [self.in_dim] + [_round_up(d, 128) for d in self.out_dims]
        flat = []
        for li, (w, b) in enumerate(zip(weights, biases)):
            ip, op = self.pdims[li], self.pdims[li + 1]
            dt = param_dtype if param_dtype is not None else w.dtype
            w_p = (jnp.zeros((ip, op), dtype=dt)
                   .at[:w.shape[0], :w.shape[1]].set(w.astype(dt)))
            b_p = (jnp.zeros((1, op), dtype=dt)
                   .at[0, :b.shape[0]].set(b.astype(dt)))
            flat += [w_p, b_p]
        self._flat_params = flat

        # Single jitted call path: batch pad + pallas_call + output slice.
        self._fwd = jax.jit(self._forward)

    def __call__(self, x):
        return self._fwd(x, *self._flat_params)

    # ---------------------------------------------------------------------
    def _choose_tile(self, batch: int) -> int:
        # Adaptive tile: never pad a tiny batch up to a huge tile.
        tm = min(self.tm_max, _round_up(batch, 8))
        # Keep >= 2 grid steps when possible so v7x's two TensorCores both get
        # work (costs ~0.35 µs of extra step overhead on single-TC v5e/v6e).
        if batch >= 16:
            tm = min(tm, _round_up((batch + 1) // 2, 8))
        return tm

    def _forward(self, x, *params):
        batch, in_dim = x.shape
        assert in_dim == self.in_dim, "input feature dim mismatch"
        nl = self.num_layers
        pdims = self.pdims
        out_pad = pdims[-1]

        tm = self._choose_tile(batch)
        batch_p = _round_up(batch, tm)
        grid = (batch_p // tm,)

        # Only the batch (row) axis is padded; features stream unpadded.
        x_in = x if batch_p == batch else jnp.pad(x, ((0, batch_p - batch), (0, 0)))

        # x: streamed batch tiles; last block dim == full array dim (legal).
        in_specs = [pl.BlockSpec((tm, in_dim), lambda i: (i, 0))]
        res_kw = {}
        if self.single_buffer_weights:
            # Block-invariant operands don't need double buffering.
            res_kw = dict(pipeline_mode=pl.Buffered(1))
        for li in range(nl):
            ip, op = pdims[li], pdims[li + 1]
            in_specs.append(pl.BlockSpec((ip, op), lambda i: (0, 0), **res_kw))
            in_specs.append(pl.BlockSpec((1, op), lambda i: (0, 0), **res_kw))
        out_spec = pl.BlockSpec((tm, out_pad), lambda i: (i, 0))

        # ---- per-generation VMEM budget --------------------------------
        param_bytes = sum(int(p.size) * p.dtype.itemsize for p in params)
        itemsize = x.dtype.itemsize
        io_bytes = 2 * tm * (in_dim + out_pad) * 4          # double-buffered tiles
        live_bytes = 2 * tm * max(pdims[1:]) * 4            # live f32 activations
        need = 2 * (param_bytes + io_bytes + live_bytes) + (4 << 20)
        try:
            vmem_cap = int(pltpu.get_tpu_info().vmem_capacity_bytes)
        except Exception:
            vmem_cap = 64 * 1024 * 1024                     # conservative (v7x)
        hard_cap = int(vmem_cap * 0.85)                     # ~56 MiB v7x, ~108 MiB v5e/v6e
        vmem_limit = int(min(hard_cap, max(16 << 20, need)))

        flops = 2 * batch_p * sum(pdims[i] * pdims[i + 1] for i in range(nl))
        bytes_accessed = batch_p * (in_dim + out_pad) * itemsize + param_bytes

        out_p = pl.pallas_call(
            make_mlp_kernel(nl, self.precision),
            out_shape=jax.ShapeDtypeStruct((batch_p, out_pad), x.dtype),
            grid=grid,
            in_specs=in_specs,
            out_specs=out_spec,
            compiler_params=pltpu.CompilerParams(
                dimension_semantics=("parallel",),   # batch tiles across TCs
                vmem_limit_bytes=vmem_limit),
            cost_estimate=pl.CostEstimate(
                flops=flops, transcendentals=0, bytes_accessed=bytes_accessed),
        )(x_in, *params)

        return out_p[:batch, :self.out_dims[-1]]


def init_base_model_params(shape, init_bias_zero=False, key=jax.random.PRNGKey(0)):
    """Deterministic init mirroring BaseModel.__init__:
    weights ~ Uniform[0, 1) (nn.init.uniform_ default), bias = ones (or zeros).
    Weights returned as (in_dim, out_dim), i.e. transposed vs torch Linear.
    """
    weights, biases = [], []
    for i in range(len(shape) - 1):
        key, wk = jax.random.split(key)
        in_dim, out_dim = shape[i], shape[i + 1]
        w = jax.random.uniform(wk, (in_dim, out_dim), dtype=jnp.float32)
        b = (jnp.zeros if init_bias_zero else jnp.ones)((out_dim,), dtype=jnp.float32)
        weights.append(w)
        biases.append(b)
    return weights, biases


def mlp_reference(x, weights, biases):
    """Plain-JAX reference matching nn.Sequential(Linear, ReLU, ..., Linear)."""
    h = x
    n = len(weights)
    for i, (w, b) in enumerate(zip(weights, biases)):
        h = jnp.dot(h, w, precision=lax.Precision.HIGHEST) + b
        if i < n - 1:
            h = jnp.maximum(h, 0.0)
    return h


if __name__ == "__main__":
    # BaseModel(shape=(32, 64, 16)): Linear(32->64), ReLU, Linear(64->16).
    # batch=256 -> adaptive tile picks TM=128 -> 2 grid steps (both v7x TCs).
    shape = (32, 64, 16)
    batch = 256

    root = jax.random.PRNGKey(0)
    kx, kp = jax.random.split(root)
    x = jax.random.normal(kx, (batch, shape[0]), dtype=jnp.float32)

    weights, biases = init_base_model_params(shape, init_bias_zero=False, key=kp)

    model = PallasMLP(weights, biases)
    y = jax.block_until_ready(model(x))

    y_ref = mlp_reference(x, weights, biases)
    assert y.shape == (batch, shape[-1])
    assert jnp.allclose(y, y_ref, rtol=1e-5, atol=1e-5), "mismatch vs reference"

    # Small, non-tile-aligned batch: adaptive tile -> 8 rows, single grid step,
    # no 16x row-padding waste anymore.
    x_small = x[:8]
    y_small = jax.block_until_ready(model(x_small))
    assert jnp.allclose(y_small, y_ref[:8], rtol=1e-5, atol=1e-5), "small-batch mismatch"

    print("KERNEL_OK")
</pallas_src>

<mosaic_0001>
module attributes {stable_mosaic.version = 11 : i64} {
  func.func @kernel(%arg0: i32, %arg1: memref<128x32xf32, #tpu.memory_space<vmem>>, %arg2: memref<32x128xf32, #tpu.memory_space<vmem>>, %arg3: memref<1x128xf32, #tpu.memory_space<vmem>>, %arg4: memref<128x128xf32, #tpu.memory_space<vmem>>, %arg5: memref<1x128xf32, #tpu.memory_space<vmem>>, %arg6: memref<128x128xf32, #tpu.memory_space<vmem>>) attributes {dimension_semantics = [#tpu.dimension_semantics<parallel>], iteration_bounds = array<i64: 2>, scalar_prefetch = 0 : i64, scratch_operands = 0 : i64, tpu.core_type = #tpu.core_type<tc>, window_params = [{transform_indices = @transform_0, window_bounds = array<i64: 128, 32>}, {pipeline_mode = #tpu.pipeline_mode<synchronous>, transform_indices = @transform_1, window_bounds = array<i64: 32, 128>}, {pipeline_mode = #tpu.pipeline_mode<synchronous>, transform_indices = @transform_2, window_bounds = array<i64: 1, 128>}, {pipeline_mode = #tpu.pipeline_mode<synchronous>, transform_indices = @transform_3, window_bounds = array<i64: 128, 128>}, {pipeline_mode = #tpu.pipeline_mode<synchronous>, transform_indices = @transform_4, window_bounds = array<i64: 1, 128>}, {transform_indices = @transform_5, window_bounds = array<i64: 128, 128>}]} {
    %c0 = arith.constant 0 : index
    %c0_0 = arith.constant 0 : index
    %0 = vector.load %arg1[%c0, %c0_0] : memref<128x32xf32, #tpu.memory_space<vmem>>, vector<128x32xf32>
    %c0_1 = arith.constant 0 : index
    %c0_2 = arith.constant 0 : index
    %1 = vector.load %arg2[%c0_1, %c0_2] : memref<32x128xf32, #tpu.memory_space<vmem>>, vector<32x128xf32>
    %cst = arith.constant dense<0.000000e+00> : vector<128x128xf32>
    %2 = tpu.matmul %0, %1, %cst {dimension_numbers = #tpu.dot_dimension_numbers<[1], [0], [0], [1], [0, 0, 1, 1], [], []>, precision = #tpu.contract_precision<fp32>} : vector<128x32xf32>, vector<32x128xf32>, vector<128x128xf32> -> vector<128x128xf32>
    %c0_3 = arith.constant 0 : index
    %c0_4 = arith.constant 0 : index
    %3 = vector.load %arg3[%c0_3, %c0_4] : memref<1x128xf32, #tpu.memory_space<vmem>>, vector<1x128xf32>
    %4 = vector.broadcast %3 : vector<1x128xf32> to vector<128x128xf32>
    %5 = arith.addf %2, %4 : vector<128x128xf32>
    %cst_5 = arith.constant 0.000000e+00 : f32
    %6 = vector.broadcast %cst_5 : f32 to vector<128x128xf32>
    %7 = arith.maximumf %5, %6 : vector<128x128xf32>
    %c0_6 = arith.constant 0 : index
    %c0_7 = arith.constant 0 : index
    %8 = vector.load %arg4[%c0_6, %c0_7] : memref<128x128xf32, #tpu.memory_space<vmem>>, vector<128x128xf32>
    %cst_8 = arith.constant dense<0.000000e+00> : vector<128x128xf32>
    %9 = tpu.matmul %7, %8, %cst_8 {dimension_numbers = #tpu.dot_dimension_numbers<[1], [0], [0], [1], [0, 0, 1, 1], [], []>, precision = #tpu.contract_precision<fp32>} : vector<128x128xf32>, vector<128x128xf32>, vector<128x128xf32> -> vector<128x128xf32>
    %c0_9 = arith.constant 0 : index
    %c0_10 = arith.constant 0 : index
    %10 = vector.load %arg5[%c0_9, %c0_10] : memref<1x128xf32, #tpu.memory_space<vmem>>, vector<1x128xf32>
    %11 = vector.broadcast %10 : vector<1x128xf32> to vector<128x128xf32>
    %12 = arith.addf %9, %11 : vector<128x128xf32>
    %c0_11 = arith.constant 0 : index
    %c0_12 = arith.constant 0 : index
    %13 = vector.load %arg6[%c0_11, %c0_12] : memref<128x128xf32, #tpu.memory_space<vmem>>, vector<128x128xf32>
    tpu.vector_store %arg6[%c0_11, %c0_12], %12 {strides = array<i32>} : memref<128x128xf32, #tpu.memory_space<vmem>>, vector<128x128xf32>,
    return
  }
  func.func @transform_0(%arg0: i32) -> (i32, i32) {
    %c0_i32 = arith.constant 0 : i32
    %c0_i32_0 = arith.constant 0 : i32
    return %arg0, %c0_i32 : i32, i32
  }
  func.func @transform_1(%arg0: i32) -> (i32, i32) {
    %c0_i32 = arith.constant 0 : i32
    %c0_i32_0 = arith.constant 0 : i32
    %c0_i32_1 = arith.constant 0 : i32
    return %c0_i32, %c0_i32_0 : i32, i32
  }
  func.func @transform_2(%arg0: i32) -> (i32, i32) {
    %c0_i32 = arith.constant 0 : i32
    %c0_i32_0 = arith.constant 0 : i32
    %c0_i32_1 = arith.constant 0 : i32
    return %c0_i32, %c0_i32_0 : i32, i32
  }
  func.func @transform_3(%arg0: i32) -> (i32, i32) {
    %c0_i32 = arith.constant 0 : i32
    %c0_i32_0 = arith.constant 0 : i32
    %c0_i32_1 = arith.constant 0 : i32
    return %c0_i32, %c0_i32_0 : i32, i32
  }
  func.func @transform_4(%arg0: i32) -> (i32, i32) {
    %c0_i32 = arith.constant 0 : i32
    %c0_i32_0 = arith.constant 0 : i32
    %c0_i32_1 = arith.constant 0 : i32
    return %c0_i32, %c0_i32_0 : i32, i32
  }
  func.func @transform_5(%arg0: i32) -> (i32, i32) {
    %c0_i32 = arith.constant 0 : i32
    %c0_i32_0 = arith.constant 0 : i32
    return %arg0, %c0_i32 : i32, i32
  }
}

</mosaic_0001>

<bundles_post_ra>
// kernel: _forward.1
= control target key start
LH: loop header
LB: loop body
LE: loop exit
PB: predicated region body
PF: predicated region fallthrough
CT: control target
= control target key end

     0   :  { %s4178_s18 = smov 0   ;;  %s5240_s0 = inlined_call_operand.vmem [shape: f32[256,32], index: 0, kind: input, shape index: {}]   ;;  %s5241_s1 = inlined_call_operand.vmem [shape: f32[32,128], index: 1, kind: input, shape index: {}]   ;;  %s5242_s2 = inlined_call_operand.vmem [shape: f32[1,128], index: 2, kind: input, shape index: {}]   ;;  %s5243_s3 = inlined_call_operand.vmem [shape: f32[128,128], index: 3, kind: input, shape index: {}]   ;;  %s5244_s4 = inlined_call_operand.vmem [shape: f32[1,128], index: 4, kind: input, shape index: {}]   ;;  %s5245_s5 = inlined_call_operand.vmem [shape: f32[256,128], index: 5, kind: output, shape index: {}]  }
   0x1 LB: > { %s2831_s19 = sadd.s32 4294967295, %s4146_s18   ;;  %p2835_p0 = scmp.ge.s32.totalorder %s4146_s18, 1  ;;  %s4146_s18 = sphi %s4178_s18, %s15_s18  }
   0x2   : > { %p188_p1 = scmp.lt.s32.totalorder %s4146_s18, 3 }
   0x4   : > { %p189_p2 = pnand %p2835_p0, %p188_p1 }
   0x6   : > { %192 = sbr.rel (%p189_p2) target bundleno = 814 (0x32e), region = 40 }
   0xd   : > { %v244_v0 = vld [vmem:[%s5241_s1] sm:$0xff]  ;;  %v245_v1 = vld [vmem:[%s5241_s1 + $0x8] sm:$0xff]  ;;  %v246_v2 = vld [vmem:[%s5241_s1 + $0x10] sm:$0xff]  ;;  %s2836_s26 = sshll.u32 %s2831_s19, 4  ;;  %vm255_vm0 = vcmask 261120  }
   0xe   : > { %v305_v3 = vand.u32 4294901760, %v244_v0  ;;  %v308_v4 = vand.u32 4294901760, %v245_v1  ;;  %v247_v5 = vld [vmem:[%s5241_s1 + $0x18] sm:$0xff]  ;;  %v311_v6 = vand.u32 4294901760, %v246_v2  ;;  %p217_p3 = scmp.lt.s32.totalorder %s2836_s26, 31 }
   0xf   : > { %v314_v7 = vand.u32 4294901760, %v247_v5 }
  0x10   : > { %v4198_v8 = vpack.c.bf16 %v308_v4, %v305_v3  ;;  %s5377_s26 = smov (!%p217_p3, %s2836_s26), 31  ;;  %v4202_v9 = vsub.f32 %v244_v0, %v305_v3  ;;  %v4204_v10 = vsub.f32 %v245_v1, %v308_v4  ;;  %v4206_v11 = vsub.f32 %v246_v2, %v311_v6 }
  0x11   : > { %v4208_v12 = vpack.c.bf16 %v314_v7, %v311_v6  ;;  %v4210_v13 = vsub.f32 %v247_v5, %v314_v7  ;;  %s2837_s29 = sshll.u32 %s5377_s26, 3 }
  0x12   : > { %3685 = vmatprep.subr.bf16.mxu0 %v4198_v8  ;;  %v536_v14 = vand.u32 4294901760, %v4202_v9  ;;  %v543_v15 = vand.u32 4294901760, %v4204_v10  ;;  %v550_v16 = vand.u32 4294901760, %v4206_v11  ;;  %s4223_s7 = scalar_lea.vmem %s5240_s0, %s2837_s29  ;;  %s5219_s25 = scalar_lea.vmem %s5245_s5, %s2837_s29 }
  0x13   : > { %3687 = vmatpush3.bf16.msra.mxu0 %v4198_v8  ;;  %v557_v17 = vand.u32 4294901760, %v4210_v13  ;;  %v228_v18 = vld [vmem:[%s4223_s7] sm:$0xff]  ;;  %v229_v21 = vld [vmem:[%s4223_s7 + $0x8] sm:$0xff]  ;;  %v230_v22 = vld [vmem:[%s4223_s7 + $0x10] sm:$0xff] }
  0x14   : > { %3689 = vmatprep.subr.bf16.mxu0 %v4208_v12  ;;  %v537_v19 = vsub.f32 %v4202_v9, %v536_v14  ;;  %v544_v20 = vsub.f32 %v4204_v10, %v543_v15  ;;  %v4235_v23 = vsub.f32 %v4206_v11, %v550_v16  ;;  %v4237_v24 = vpack.c.bf16 %v543_v15, %v536_v14  ;;  %v231_v28 = vld [vmem:[%s4223_s7 + $0x18] sm:$0xff]  ;;  %v232_v29 = vld [vmem:[%s4223_s7 + $0x20] sm:$0xff]  ;;  %v233_v30 = vld [vmem:[%s4223_s7 + $0x28] sm:$0xff] }
  0x15   : > { %v257_v25 = vsel %vm255_vm0, %v228_v18, 0  ;;  %v260_v26 = vsel %vm255_vm0, %v229_v21, 0  ;;  %v263_v27 = vsel %vm255_vm0, %v230_v22, 0  ;;  %v4248_v31 = vsub.f32 %v4210_v13, %v557_v17  ;;  %v234_v36 = vld [vmem:[%s4223_s7 + $0x30] sm:$0xff]  ;;  %v235_v45 = vld [vmem:[%s4223_s7 + $0x38] sm:$0xff]  ;;  %v236_v2 = vld [vmem:[%s4223_s7 + $0x40] sm:$0xff] }
  0x16   : > { %v4250_v32 = vand.u32 4294901760, %v257_v25  ;;  %v538_v33 = vand.u32 4294901760, %v537_v19  ;;  %v545_v34 = vand.u32 4294901760, %v544_v20  ;;  %v4252_v35 = vand.u32 4294901760, %v260_v26  ;;  %v237_v19 = vld [vmem:[%s4223_s7 + $0x48] sm:$0xff]  ;;  %v238_v20 = vld [vmem:[%s4223_s7 + $0x50] sm:$0xff] }
  0x17   : > { %3691 = vmatpush3.bf16.msra.mxu0 %v4208_v12  ;;  %v4256_v37 = vand.u32 4294901760, %v263_v27  ;;  %v266_v38 = vsel %vm255_vm0, %v231_v28, 0  ;;  %v269_v39 = vsel %vm255_vm0, %v232_v29, 0  ;;  %v272_v40 = vsel %vm255_vm0, %v233_v30, 0 }
  0x18   : > { %v4262_v41 = vsub.f32 %v257_v25, %v4250_v32  ;;  %v3692_v42 = vpack.c.bf16 %v545_v34, %v538_v33  ;;  %v4265_v43 = vsub.f32 %v260_v26, %v4252_v35  ;;  %v4267_v44 = vand.u32 4294901760, %v266_v38  ;;  %v239_v33 = vld [vmem:[%s4223_s7 + $0x58] sm:$0xff]  ;;  %v240_v34 = vld [vmem:[%s4223_s7 + $0x60] sm:$0xff] }
  0x19   : > { %v4271_v46 = vsub.f32 %v263_v27, %v4256_v37  ;;  %v4273_v47 = vand.u32 4294901760, %v269_v39  ;;  %v4275_v48 = vand.u32 4294901760, %v272_v40  ;;  %v275_v49 = vsel %vm255_vm0, %v234_v36, 0  ;;  %v241_v36 = vld [vmem:[%s4223_s7 + $0x68] sm:$0xff] }
  0x1a   : > { %v375_v50 = vand.u32 4294901760, %v4262_v41  ;;  %3693 = vmatprep.subr.bf16.mxu0 %v3692_v42  ;;  %v385_v51 = vand.u32 4294901760, %v4265_v43  ;;  %v4281_v52 = vsub.f32 %v266_v38, %v4267_v44  ;;  %v4283_v53 = vand.u32 4294901760, %v275_v49 }
  0x1b   : > { %v395_v54 = vand.u32 4294901760, %v4271_v46  ;;  %v4287_v55 = vsub.f32 %v269_v39, %v4273_v47  ;;  %v4290_v56 = vsub.f32 %v272_v40, %v4275_v48  ;;  %v278_v57 = vsel %vm255_vm0, %v235_v45, 0 }
  0x1c   : > { %v376_v58 = vsub.f32 %v4262_v41, %v375_v50  ;;  %v386_v59 = vsub.f32 %v4265_v43, %v385_v51  ;;  %v405_v60 = vand.u32 4294901760, %v4281_v52  ;;  %v4301_v61 = vsub.f32 %v275_v49, %v4283_v53 }
  0x1d   : > { %v396_v62 = vsub.f32 %v4271_v46, %v395_v54  ;;  %v415_v63 = vand.u32 4294901760, %v4287_v55  ;;  %v425_v0 = vand.u32 4294901760, %v4290_v56  ;;  %v4308_v1 = vand.u32 4294901760, %v278_v57 }
  0x1e   : > { %v377_v3 = vand.u32 4294901760, %v376_v58  ;;  %v387_v4 = vand.u32 4294901760, %v386_v59  ;;  %v406_v5 = vsub.f32 %v4281_v52, %v405_v60  ;;  %v5263_v6 = vand.u32 4294901760, %v4301_v61 }
  0x1f   : > { %v397_v7 = vand.u32 4294901760, %v396_v62  ;;  %v416_v14 = vsub.f32 %v4287_v55, %v415_v63  ;;  %v426_v15 = vsub.f32 %v4290_v56, %v425_v0  ;;  %v4322_v18 = vsub.f32 %v278_v57, %v4308_v1 }
  0x20   : > { %3164 = vmatprep.mubr.f32.mxu0 %v377_v3  ;;  %v407_v21 = vand.u32 4294901760, %v406_v5  ;;  %v281_v22 = vsel %vm255_vm0, %v236_v2, 0  ;;  %v552_v25 = vand.u32 4294901760, %v4235_v23  ;;  %v4330_v26 = vpack.c.bf16 %v4204_v10, %v4202_v9  ;;  %v243_v5 = vld [vmem:[%s4223_s7 + $0x78] sm:$0xff] }
  0x21   : > { %3165 = vmatmul.mubr.f32.vlgmr.msra.gmra.mrb[0].mxu0 %v387_v4  ;;  %v417_v27 = vand.u32 4294901760, %v416_v14  ;;  %v436_v28 = vsub.f32 %v4301_v61, %v5263_v6  ;;  %v5262_v29 = vand.u32 4294901760, %v4322_v18  ;;  %v4336_v30 = vand.u32 4294901760, %v281_v22 }
  0x22   : > { %3695 = vmatpush3.bf16.msra.mxu0 %v3692_v42  ;;  %3167 = vmatprep.mubr.f32.mxu0 %v397_v7  ;;  %v427_v23 = vand.u32 4294901760, %v426_v15  ;;  %v559_v9 = vand.u32 4294901760, %v4248_v31  ;;  %v284_v10 = vsel %vm255_vm0, %v237_v19, 0  ;;  %v287_v38 = vsel %vm255_vm0, %v238_v20, 0  ;;  %v242_v42 = vld [vmem:[%s4223_s7 + $0x70] sm:$0xff] }
  0x23   : > { %v446_v39 = vsub.f32 %v4322_v18, %v5262_v29  ;;  %v4348_v40 = vsub.f32 %v281_v22, %v4336_v30  ;;  %v4350_v45 = vand.u32 4294901760, %v284_v10  ;;  %v4352_v49 = vand.u32 4294901760, %v287_v38 }
  0x24   : > { %v3696_v57 = vpack.c.bf16 %v559_v9, %v552_v25  ;;  %v290_v31 = vsel %vm255_vm0, %v239_v33, 0  ;;  %v293_v58 = vsel %vm255_vm0, %v240_v34, 0  ;;  %v296_v59 = vsel %vm255_vm0, %v241_v36, 0 }
  0x25   : > { %3168 = vmatmul.mubr.f32.gmra.mrb[2].mxu0 %v407_v21  ;;  %v437_v62 = vand.u32 4294901760, %v436_v28  ;;  %v5259_v2 = vand.u32 4294901760, %v4348_v40  ;;  %v4360_v3 = vsub.f32 %v284_v10, %v4350_v45  ;;  %v4363_v4 = vsub.f32 %v287_v38, %v4352_v49 }
  0x26   : > { %3170 = vmatprep.mubr.f32.mxu0 %v417_v27  ;;  %3697 = vmatprep.subr.bf16.mxu0 %v3696_v57  ;;  %v4366_v7 = vand.u32 4294901760, %v290_v31  ;;  %v4368_v14 = vand.u32 4294901760, %v293_v58  ;;  %v4370_v15 = vand.u32 4294901760, %v296_v59  ;;  %v299_v19 = vsel %vm255_vm0, %v242_v42, 0 }
  0x27   : > { %v456_v20 = vsub.f32 %v4348_v40, %v5259_v2  ;;  %v5258_v21 = vand.u32 4294901760, %v4360_v3  ;;  %3699 = vmatpush3.bf16.msra.mxu0 %v3696_v57  ;;  %v5257_v22 = vand.u32 4294901760, %v4363_v4  ;;  %v4378_v25 = vand.u32 4294901760, %v299_v19  ;;  %v4560_v2 = vld [vmem:[%s5243_s3 + $0x58] sm:$0xff] }
  0x28   : > { %v447_v27 = vand.u32 4294901760, %v446_v39  ;;  %v4381_v28 = vsub.f32 %v290_v31, %v4366_v7  ;;  %v4384_v33 = vsub.f32 %v293_v58, %v4368_v14  ;;  %v302_v34 = vsel %vm255_vm0, %v243_v5, 0  ;;  %3701 = vmatprep.subr.bf16.mxu0 %v4330_v26 }
  0x29   : > { %3171 = vmatmul.mubr.f32.gmra.mrb[4].mxu0 %v427_v23  ;;  %v457_v36 = vand.u32 4294901760, %v456_v20  ;;  %v466_v9 = vsub.f32 %v4360_v3, %v5258_v21  ;;  %v476_v10 = vsub.f32 %v4363_v4, %v5257_v22  ;;  %v4395_v38 = vsub.f32 %v296_v59, %v4370_v15  ;;  %v4555_v21 = vld [vmem:[%s5243_s3 + $0x50] sm:$0xff] }
  0x2a   : > { %3173 = vmatprep.mubr.f32.mxu0 %v437_v62  ;;  %v5246_v39 = vand.u32 4294901760, %v4381_v28  ;;  %v5254_v42 = vand.u32 4294901760, %v4384_v33  ;;  %v4400_v57 = vsub.f32 %v299_v19, %v4378_v25  ;;  %v4402_v23 = vand.u32 4294901760, %v302_v34 }
  0x2b   : > { %v4408_v31 = vpack.c.bf16 %v557_v17, %v550_v16  ;;  %v467_v58 = vand.u32 4294901760, %v466_v9  ;;  %v5253_v62 = vand.u32 4294901760, %v4395_v38  ;;  %v477_v19 = vand.u32 4294901760, %v476_v10 }
  0x2c   : > { %v486_v59 = vsub.f32 %v4381_v28, %v5246_v39  ;;  %v4415_v5 = vsub.f32 %v302_v34, %v4402_v23  ;;  %v496_v20 = vsub.f32 %v4384_v33, %v5254_v42  ;;  %v5252_v16 = vand.u32 4294901760, %v4400_v57  ;;  %v4538_v42 = vld [vmem:[%s5243_s3 + $0x48] sm:$0xff] }
  0x2d   : > { %3174 = vmatmul.mubr.f32.gmra.mrb[6].mxu0 %v447_v27  ;;  %v506_v27 = vsub.f32 %v4395_v38, %v5253_v62  ;;  %v4533_v62 = vld [vmem:[%s5243_s3 + $0x40] sm:$0xff]  ;;  %v1501_v22 = vand.u32 4294901760, %v4538_v42  ;;  %v1507_v29 = vand.u32 4294901760, %v4560_v2 }
  0x2e   : > { %3176 = vmatprep.mubr.f32.mxu0 %v457_v36  ;;  %v487_v17 = vand.u32 4294901760, %v486_v59  ;;  %v5247_v9 = vand.u32 4294901760, %v4415_v5  ;;  %v497_v39 = vand.u32 4294901760, %v496_v20  ;;  %v516_v34 = vsub.f32 %v4400_v57, %v5252_v16 }
  0x2f   : > { %v507_v36 = vand.u32 4294901760, %v506_v27 }
  0x30   : > { %v526_v10 = vsub.f32 %v4415_v5, %v5247_v9 }
  0x31   : > { %3177 = vmatmul.mubr.f32.gmra.mrb[8].mxu0 %v467_v58  ;;  %v517_v58 = vand.u32 4294901760, %v516_v34 }
  0x32   : > { %3179 = vmatprep.mubr.f32.mxu0 %v477_v19  ;;  %v527_v59 = vand.u32 4294901760, %v526_v10  ;;  %v3704_v19 = vpack.c.bf16 %v4210_v13, %v4206_v11  ;;  %v4454_v11 = vld [vmem:[%s5243_s3] sm:$0xff]  ;;  %v4459_v13 = vld [vmem:[%s5243_s3 + $0x8] sm:$0xff] }
  0x33   : > { %v5248_v20 = vand.u32 4294901760, %v4459_v13  ;;  %v4484_v10 = vld [vmem:[%s5243_s3 + $0x28] sm:$0xff] }
  0x34   : > { %v5255_v9 = vand.u32 4294901760, %v4484_v10 }
  0x35   : > { %3180 = vmatmul.mubr.f32.gmra.mrb[10].mxu0 %v487_v17  ;;  %v4472_v17 = vld [vmem:[%s5243_s3 + $0x18] sm:$0xff] }
  0x36   : > { %3182 = vmatprep.mubr.f32.mxu0 %v497_v39  ;;  %v5249_v39 = vand.u32 4294901760, %v4454_v11  ;;  %v5250_v34 = vand.u32 4294901760, %v4472_v17 }
  0x39   : > { %3183 = vmatmul.mubr.f32.gmra.mrb[12].mxu0 %v507_v36  ;;  %v4479_v36 = vld [vmem:[%s5243_s3 + $0x20] sm:$0xff] }
  0x3a   : > { %3185 = vmatprep.mubr.f32.mxu0 %v517_v58  ;;  %v4491_v58 = vpack.c.bf16 %v5248_v20, %v5249_v39  ;;  %v4509_v20 = vld [vmem:[%s5243_s3 + $0x30] sm:$0xff]  ;;  %v4514_v39 = vld [vmem:[%s5243_s3 + $0x38] sm:$0xff] }
  0x3b   : > { %v5260_v16 = vand.u32 4294901760, %v4514_v39 }
  0x3c   : > { %3733 = vmatprep.subr.bf16.mxu1 %v4491_v58 }
  0x3d   : > { %3186 = vmatmul.mubr.f32.gmra.mrb[14].mxu0 %v527_v59  ;;  %3735 = vmatpush3.bf16.msra.mxu1 %v4491_v58 }
  0x3e   : > { %3196 = vmatprep.mubr.f32.mxu0 %v4250_v32 }
  0x41   : > { %3197 = vmatmul.mubr.f32.vlgmr.msra.gmra.mrb[0].mxu0 %v4252_v35 }
  0x42   : > { %3703 = vmatpush3.bf16.msra.mxu0 %v4330_v26  ;;  %3199 = vmatprep.mubr.f32.mxu0 %v4256_v37  ;;  %v4464_v26 = vld [vmem:[%s5243_s3 + $0x10] sm:$0xff] }
  0x43   : > { %3705 = vmatprep.subr.bf16.mxu0 %v3704_v19  ;;  %v5251_v27 = vand.u32 4294901760, %v4464_v26 }
  0x45   : > { %3200 = vmatmul.mubr.f32.gmra.mrb[2].mxu0 %v4267_v44  ;;  %v4500_v59 = vpack.c.bf16 %v5250_v34, %v5251_v27  ;;  %v5261_v27 = vand.u32 4294901760, %v4509_v20 }
  0x46   : > { %3202 = vmatprep.mubr.f32.mxu0 %v4273_v47  ;;  %3707 = vmatpush3.bf16.msra.mxu0 %v3704_v19  ;;  %v5256_v19 = vand.u32 4294901760, %v4479_v36 }
  0x47   : > { %3709 = vmatprep.subr.bf16.mxu0 %v4198_v8  ;;  %3737 = vmatprep.subr.bf16.mxu1 %v4500_v59 }
  0x48   : > { %v4525_v34 = vpack.c.bf16 %v5255_v9, %v5256_v19  ;;  %3739 = vmatpush3.bf16.msra.mxu1 %v4500_v59  ;;  %v4547_v9 = vpack.c.bf16 %v5260_v16, %v5261_v27  ;;  %v1498_v19 = vand.u32 4294901760, %v4533_v62  ;;  %v1504_v27 = vand.u32 4294901760, %v4555_v21 }
  0x49   : > { %3203 = vmatmul.mubr.f32.gmra.mrb[4].mxu0 %v4275_v48 }
  0x4a   : > { %3205 = vmatprep.mubr.f32.mxu0 %v4283_v53  ;;  %3741 = vmatprep.subr.bf16.mxu1 %v4525_v34  ;;  %v4569_v16 = vpack.c.bf16 %v1501_v22, %v1498_v19  ;;  %v4581_v6 = vpack.c.bf16 %v1507_v29, %v1504_v27 }
  0x4c   : > { %3743 = vmatpush3.bf16.msra.mxu1 %v4525_v34  ;;  %5306 = vst [vmem:[#allocation2_spill] sm:$0xff] %v4569_v16  ;;  %5307 = vst [vmem:[#allocation3_spill] sm:$0xff] %v4581_v6 }
  0x4d   : > { %3206 = vmatmul.mubr.f32.gmra.mrb[6].mxu0 %v4308_v1  ;;  %3745 = vmatprep.subr.bf16.mxu1 %v4547_v9 }
  0x4e   : > { %3208 = vmatprep.mubr.f32.mxu0 %v4336_v30 }
  0x50   : > { %3747 = vmatpush3.bf16.msra.mxu1 %v4547_v9 }
  0x51   : > { %3209 = vmatmul.mubr.f32.gmra.mrb[8].mxu0 %v4350_v45  ;;  %3749 = vmatprep.subr.bf16.mxu1 %v4569_v16 }
  0x52   : > { %3211 = vmatprep.mubr.f32.mxu0 %v4352_v49 }
  0x54   : > { %3751 = vmatpush3.bf16.msra.mxu1 %v4569_v16 }
  0x55   : > { %3212 = vmatmul.mubr.f32.gmra.mrb[10].mxu0 %v4366_v7  ;;  %3753 = vmatprep.subr.bf16.mxu1 %v4581_v6 }
  0x56   : > { %3214 = vmatprep.mubr.f32.mxu0 %v4368_v14 }
  0x58   : > { %3755 = vmatpush3.bf16.msra.mxu1 %v4581_v6 }
  0x59   : > { %3215 = vmatmul.mubr.f32.gmra.mrb[12].mxu0 %v4370_v15 }
  0x5a   : > { %3217 = vmatprep.mubr.f32.mxu0 %v4378_v25 }
  0x5d   : > { %3218 = vmatmul.mubr.f32.gmra.mrb[14].mxu0 %v4402_v23 }
  0x5e   : > { %3228 = vmatprep.mubr.f32.mxu0 %v4262_v41  ;;  %v5309_v41 = vand.u32 4294901760, %v4322_v18 }
  0x61   : > { %3229 = vmatmul.mubr.f32.vlgmr.msra.gmra.mrb[0].mxu0 %v4265_v43  ;;  %v5310_v43 = vand.u32 4294901760, %v4348_v40 }
  0x62   : > { %3711 = vmatpush3.bf16.msra.mxu0 %v4198_v8  ;;  %3231 = vmatprep.mubr.f32.mxu0 %v4271_v46  ;;  %v5311_v46 = vand.u32 4294901760, %v4360_v3 }
  0x63   : > { %3713 = vmatprep.subr.bf16.mxu0 %v4208_v12 }
  0x65   : > { %3232 = vmatmul.mubr.f32.gmra.mrb[2].mxu0 %v4281_v52  ;;  %v5314_v52 = vand.u32 4294901760, %v4384_v33 }
  0x66   : > { %3234 = vmatprep.mubr.f32.mxu0 %v4287_v55  ;;  %3715 = vmatpush3.bf16.msra.mxu0 %v4208_v12  ;;  %v5316_v55 = vand.u32 4294901760, %v4400_v57 }
  0x67   : > { %3717 = vmatprep.subr.bf16.mxu0 %v4237_v24 }
  0x69   : > { %3235 = vmatmul.mubr.f32.gmra.mrb[4].mxu0 %v4290_v56  ;;  %v5317_v56 = vand.u32 4294901760, %v4415_v5 }
  0x6a   : > { %3237 = vmatprep.mubr.f32.mxu0 %v4301_v61 }
  0x6d   : > { %3238 = vmatmul.mubr.f32.gmra.mrb[6].mxu0 %v4322_v18 }
  0x6e   : > { %3240 = vmatprep.mubr.f32.mxu0 %v4348_v40 }
  0x71   : > { %3241 = vmatmul.mubr.f32.gmra.mrb[8].mxu0 %v4360_v3 }
  0x72   : > { %3243 = vmatprep.mubr.f32.mxu0 %v4363_v4 }
  0x75   : > { %3244 = vmatmul.mubr.f32.gmra.mrb[10].mxu0 %v4381_v28 }
  0x76   : > { %3246 = vmatprep.mubr.f32.mxu0 %v4384_v33 }
  0x79   : > { %3247 = vmatmul.mubr.f32.gmra.mrb[12].mxu0 %v4395_v38 }
  0x7a   : > { %3249 = vmatprep.mubr.f32.mxu0 %v4400_v57 }
  0x7d   : > { %3250 = vmatmul.mubr.f32.gmra.mrb[14].mxu0 %v4415_v5 }
  0x7e   : > { %3260 = vmatprep.mubr.f32.mxu0 %v375_v50  ;;  %v5312_v50 = vand.u32 4294901760, %v4363_v4 }
  0x81   : > { %3261 = vmatmul.mubr.f32.vlgmr.msra.gmra.mrb[0].mxu0 %v385_v51  ;;  %v5313_v51 = vand.u32 4294901760, %v4381_v28 }
  0x82   : > { %3719 = vmatpush3.bf16.msra.mxu0 %v4237_v24  ;;  %3263 = vmatprep.mubr.f32.mxu0 %v395_v54  ;;  %v5308_v24 = vand.u32 4294901760, %v4301_v61  ;;  %v5315_v54 = vand.u32 4294901760, %v4395_v38  ;;  %v5320_v61 = vand.u32 4294901760, %v4454_v11 }
  0x83   : > { %3721 = vmatprep.subr.bf16.mxu0 %v4408_v31 }
  0x85   : > { %3264 = vmatmul.mubr.f32.gmra.mrb[2].mxu0 %v405_v60 }
  0x86   : > { %3266 = vmatprep.mubr.f32.mxu0 %v415_v63  ;;  %3723 = vmatpush3.bf16.msra.mxu0 %v4408_v31  ;;  %v4701_v63 = vsub.f32 %v4454_v11, %v5320_v61 }
  0x87   : > { %3725 = vmatprep.subr.bf16.mxu0 %v4198_v8 }
  0x88   : > { %5321 = vst [vmem:[#allocation6_spill] sm:$0xff] %v4701_v63  ;;  %v5279_v18 = vand.u32 4294901760, %v4701_v63 }
  0x89   : > { %3267 = vmatmul.mubr.f32.gmra.mrb[4].mxu0 %v425_v0  ;;  %v5322_v0 = vand.u32 4294901760, %v4459_v13 }
  0x8a   : > { %3269 = vmatprep.mubr.f32.mxu0 %v5308_v24  ;;  %v1718_v40 = vsub.f32 %v4701_v63, %v5279_v18 }
  0x8d   : > { %3270 = vmatmul.mubr.f32.gmra.mrb[6].mxu0 %v5309_v41 }
  0x8e   : > { %3272 = vmatprep.mubr.f32.mxu0 %v5310_v43 }
  0x91   : > { %3273 = vmatmul.mubr.f32.gmra.mrb[8].mxu0 %v5311_v46 }
  0x92   : > { %3275 = vmatprep.mubr.f32.mxu0 %v5312_v50 }
  0x95   : > { %3276 = vmatmul.mubr.f32.gmra.mrb[10].mxu0 %v5313_v51 }
  0x96   : > { %3278 = vmatprep.mubr.f32.mxu0 %v5314_v52 }
  0x99   : > { %3279 = vmatmul.mubr.f32.gmra.mrb[12].mxu0 %v5315_v54 }
  0x9a   : > { %3281 = vmatprep.mubr.f32.mxu0 %v5316_v55  ;;  %v5328_v55 = vand.u32 4294901760, %v4464_v26 }
  0x9d   : > { %3282 = vmatmul.mubr.f32.gmra.mrb[14].mxu0 %v5317_v56  ;;  %v4762_v56 = vsub.f32 %v4464_v26, %v5328_v55 }
  0x9e   : > { %3292 = vmatprep.mubr.f32.mxu0 %v4250_v32 }
  0x9f   : > { %v5276_v61 = vand.u32 4294901760, %v4762_v56 }
  0xa1   : > { %3293 = vmatmul.mubr.f32.vlgmr.msra.gmra.mrb[0].mxu0 %v4252_v35 }
  0xa2   : > { %3727 = vmatpush3.bf16.msra.mxu0 %v4198_v8  ;;  %3295 = vmatprep.mubr.f32.mxu0 %v4256_v37  ;;  %v1462_v8 = vld [vmem:[%s5243_s3 + $0x60] sm:$0xff] }
  0xa3   : > { %3729 = vmatprep.subr.bf16.mxu0 %v4208_v12 }
  0xa5   : > { %3296 = vmatmul.mubr.f32.gmra.mrb[2].mxu0 %v4267_v44 }
  0xa6   : > { %3298 = vmatprep.mubr.f32.mxu0 %v4273_v47  ;;  %3731 = vmatpush3.bf16.msra.mxu0 %v4208_v12  ;;  %v1463_v12 = vld [vmem:[%s5243_s3 + $0x68] sm:$0xff] }
  0xa7   : > { %3893 = vmatprep.subr.bf16.mxu0 %v4491_v58 }
  0xa9   : > { %3299 = vmatmul.mubr.f32.gmra.mrb[4].mxu0 %v4275_v48 }
  0xaa   : > { %3301 = vmatprep.mubr.f32.mxu0 %v4283_v53 }
  0xad   : > { %3302 = vmatmul.mubr.f32.gmra.mrb[6].mxu0 %v4308_v1 }
  0xae   : > { %3304 = vmatprep.mubr.f32.mxu0 %v4336_v30 }
  0xb1   : > { %3305 = vmatmul.mubr.f32.gmra.mrb[8].mxu0 %v4350_v45 }
  0xb2   : > { %3307 = vmatprep.mubr.f32.mxu0 %v4352_v49 }
  0xb5   : > { %3308 = vmatmul.mubr.f32.gmra.mrb[10].mxu0 %v4366_v7 }
  0xb6   : > { %3310 = vmatprep.mubr.f32.mxu0 %v4368_v14 }
  0xb9   : > { %3311 = vmatmul.mubr.f32.gmra.mrb[12].mxu0 %v4370_v15 }
  0xba   : > { %3313 = vmatprep.mubr.f32.mxu0 %v4378_v25 }
  0xbd   : > { %3314 = vmatmul.mubr.f32.gmra.mrb[14].mxu0 %v4402_v23 }
  0xbe   : > { %3324 = vmatprep.mubr.f32.mxu0 %v4250_v32  ;;  %v1510_v32 = vand.u32 4294901760, %v1462_v8 }
  0xc1   : > { %3325 = vmatmul.mubr.f32.vlgmr.msra.gmra.mrb[0].mxu0 %v4252_v35  ;;  %v1513_v35 = vand.u32 4294901760, %v1463_v12 }
  0xc2   : > { %3327 = vmatprep.mubr.f32.mxu0 %v4256_v37  ;;  %3895 = vmatpush3.bf16.msra.mxu0 %v4491_v58 }
  0xc3   : > { %3897 = vmatprep.subr.bf16.mxu0 %v4500_v59  ;;  %v4680_v37 = vpack.c.bf16 %v1513_v35, %v1510_v32 }
  0xc5   : > { %3328 = vmatmul.mubr.f32.gmra.mrb[2].mxu0 %v4267_v44  ;;  %5318 = vst [vmem:[#allocation4_spill] sm:$0xff] %v4680_v37  ;;  %v1464_v44 = vld [vmem:[%s5243_s3 + $0x70] sm:$0xff]  ;;  %3757 = vmatprep.subr.bf16.mxu1 %v4680_v37 }
  0xc6   : > { %3330 = vmatprep.mubr.f32.mxu0 %v4273_v47  ;;  %3899 = vmatpush3.bf16.msra.mxu0 %v4500_v59  ;;  %v1465_v47 = vld [vmem:[%s5243_s3 + $0x78] sm:$0xff] }
  0xc7   : > { %3901 = vmatprep.subr.bf16.mxu0 %v4525_v34  ;;  %3759 = vmatpush3.bf16.msra.mxu1 %v4680_v37 }
  0xc9   : > { %3331 = vmatmul.mubr.f32.gmra.mrb[4].mxu0 %v4275_v48  ;;  %v1516_v48 = vand.u32 4294901760, %v1464_v44 }
  0xca   : > { %3333 = vmatprep.mubr.f32.mxu0 %v4283_v53  ;;  %3903 = vmatpush3.bf16.msra.mxu0 %v4525_v34  ;;  %v1519_v53 = vand.u32 4294901760, %v1465_v47 }
  0xcb   : > { %3905 = vmatprep.subr.bf16.mxu0 %v4547_v9  ;;  %v4731_v38 = vsub.f32 %v1464_v44, %v1516_v48  ;;  %v5331_v44 = vand.u32 4294901760, %v4484_v10 }
  0xcc   : > { %v4692_v60 = vpack.c.bf16 %v1519_v53, %v1516_v48  ;;  %v4733_v57 = vsub.f32 %v1465_v47, %v1519_v53  ;;  %v5332_v48 = vand.u32 4294901760, %v4509_v20  ;;  %v5333_v53 = vand.u32 4294901760, %v4514_v39 }
  0xcd   : > { %3334 = vmatmul.mubr.f32.gmra.mrb[6].mxu0 %v4308_v1  ;;  %v4706_v1 = vsub.f32 %v4459_v13, %v5322_v0  ;;  %5326 = vst [vmem:[#allocation10_spill] sm:$0xff] %v4731_v38  ;;  %v5265_v5 = vand.u32 4294901760, %v4731_v38  ;;  %v4777_v47 = vsub.f32 %v4484_v10, %v5331_v44 }
  0xce   : > { %3336 = vmatprep.mubr.f32.mxu0 %v4336_v30  ;;  %3907 = vmatpush3.bf16.msra.mxu0 %v4547_v9  ;;  %5319 = vst [vmem:[#allocation5_spill] sm:$0xff] %v4692_v60  ;;  %5327 = vst [vmem:[#allocation11_spill] sm:$0xff] %v4733_v57  ;;  %v5264_v11 = vand.u32 4294901760, %v4733_v57  ;;  %v4757_v54 = vpack.c.bf16 %v4733_v57, %v4731_v38  ;;  %v4782_v26 = vsub.f32 %v4509_v20, %v5332_v48  ;;  %v4798_v20 = vld [vmem:[%s5242_s2] ss:$0 sm:$0xff] }
  0xcf   : > { %3909 = vmatprep.subr.bf16.mxu0 %v4569_v16  ;;  %3761 = vmatprep.subr.bf16.mxu1 %v4692_v60  ;;  %5323 = vst [vmem:[#allocation7_spill] sm:$0xff] %v4706_v1  ;;  %v5278_v30 = vand.u32 4294901760, %v4706_v1  ;;  %v1816_v24 = vsub.f32 %v4731_v38, %v5265_v5  ;;  %v4749_v51 = vpack.c.bf16 %v4706_v1, %v4701_v63 }
  0xd0   : > { %3763 = vmatpush3.bf16.msra.mxu1 %v4692_v60  ;;  %v1823_v41 = vsub.f32 %v4733_v57, %v5264_v11  ;;  %v5271_v10 = vand.u32 4294901760, %v4782_v26 }
  0xd1   : > { %3337 = vmatmul.mubr.f32.gmra.mrb[8].mxu0 %v4350_v45  ;;  %v1725_v45 = vsub.f32 %v4706_v1, %v5278_v30  ;;  %v1817_v43 = vand.u32 4294901760, %v1816_v24 }
  0xd2   : > { %3339 = vmatprep.mubr.f32.mxu0 %v4352_v49  ;;  %3911 = vmatpush3.bf16.msra.mxu0 %v4569_v16  ;;  %v1719_v49 = vand.u32 4294901760, %v1718_v40  ;;  %v1824_v46 = vand.u32 4294901760, %v1823_v41  ;;  %v5272_v40 = vand.u32 4294901760, %v4777_v47  ;;  %v4826_v41 = vsub.f32 %v4538_v42, %v1501_v22 }
  0xd3   : > { %3913 = vmatprep.subr.bf16.mxu0 %v4581_v6  ;;  %v1726_v3 = vand.u32 4294901760, %v1725_v45 }
  0xd4   : > { %v4745_v50 = vpack.c.bf16 %v1824_v46, %v1817_v43 }
  0xd5   : > { %3340 = vmatmul.mubr.f32.gmra.mrb[10].mxu0 %v4366_v7  ;;  %v4716_v4 = vpack.c.bf16 %v1726_v3, %v1719_v49  ;;  %v4719_v7 = vsub.f32 %v1462_v8, %v1510_v32  ;;  %v5329_v8 = vand.u32 4294901760, %v4472_v17  ;;  %v5330_v32 = vand.u32 4294901760, %v4479_v36 }
  0xd6   : > { %3342 = vmatprep.mubr.f32.mxu0 %v4368_v14  ;;  %3915 = vmatpush3.bf16.msra.mxu0 %v4581_v6  ;;  %v4721_v14 = vsub.f32 %v1463_v12, %v1513_v35 }
  0xd7   : > { %3917 = vmatprep.subr.bf16.mxu0 %v4680_v37  ;;  %3765 = vmatprep.subr.bf16.mxu1 %v4716_v4  ;;  %5324 = vst [vmem:[#allocation8_spill] sm:$0xff] %v4719_v7  ;;  %v4767_v12 = vsub.f32 %v4472_v17, %v5329_v8  ;;  %v4772_v35 = vsub.f32 %v4479_v36, %v5330_v32 }
  0xd8   : > { %5325 = vst [vmem:[#allocation9_spill] sm:$0xff] %v4721_v14  ;;  %v4753_v52 = vpack.c.bf16 %v4721_v14, %v4719_v7  ;;  %v4787_v17 = vsub.f32 %v4514_v39, %v5333_v53  ;;  %v1732_v39 = vsub.f32 %v4762_v56, %v5276_v61 }
  0xd9   : > { %3343 = vmatmul.mubr.f32.gmra.mrb[12].mxu0 %v4370_v15  ;;  %v5267_v15 = vand.u32 4294901760, %v4719_v7  ;;  %v5275_v36 = vand.u32 4294901760, %v4767_v12  ;;  %v5273_v0 = vand.u32 4294901760, %v4772_v35 }
  0xda   : > { %3345 = vmatprep.mubr.f32.mxu0 %v4378_v25  ;;  %3919 = vmatpush3.bf16.msra.mxu0 %v4680_v37  ;;  %v5266_v25 = vand.u32 4294901760, %v4721_v14  ;;  %v5268_v45 = vand.u32 4294901760, %v4787_v17 }
  0xdb   : > { %3921 = vmatprep.subr.bf16.mxu0 %v4692_v60  ;;  %v1802_v28 = vsub.f32 %v4719_v7, %v5267_v15  ;;  %v1739_v49 = vsub.f32 %v4767_v12, %v5275_v36  ;;  %v1746_v3 = vsub.f32 %v4772_v35, %v5273_v0  ;;  %v5269_v15 = vand.u32 4294901760, %v4826_v41 }
  0xdc   : > { %v1809_v33 = vsub.f32 %v4721_v14, %v5266_v25  ;;  %v1767_v24 = vsub.f32 %v4787_v17, %v5268_v45 }
  0xdd   : > { %3346 = vmatmul.mubr.f32.gmra.mrb[14].mxu0 %v4402_v23  ;;  %v1803_v23 = vand.u32 4294901760, %v1802_v28  ;;  %v1753_v28 = vsub.f32 %v4777_v47, %v5272_v40  ;;  %v1740_v55 = vand.u32 4294901760, %v1739_v49  ;;  %v1747_v32 = vand.u32 4294901760, %v1746_v3 }
  0xde   : > { %3923 = vmatpush3.bf16.msra.mxu0 %v4692_v60  ;;  %v1810_v31 = vand.u32 4294901760, %v1809_v33  ;;  %v4815_v33 = vsub.f32 %v4533_v62, %v1498_v19  ;;  %v1733_v19 = vand.u32 4294901760, %v1732_v39  ;;  %v1768_v25 = vand.u32 4294901760, %v1767_v24 }
  0xdf   : > { %v1754_v44 = vand.u32 4294901760, %v1753_v28 }
  0xe0   : > { %v4737_v13 = vpack.c.bf16 %v1810_v31, %v1803_v23  ;;  %v1760_v31 = vsub.f32 %v4782_v26, %v5271_v10  ;;  %v5270_v48 = vand.u32 4294901760, %v4815_v33  ;;  %v4838_v49 = vpack.c.bf16 %v1740_v55, %v1733_v19 }
  0xe1   : > { %v1781_v19 = vsub.f32 %v4826_v41, %v5269_v15 }
  0xe2   : > { %v1761_v5 = vand.u32 4294901760, %v1760_v31  ;;  %v1774_v31 = vsub.f32 %v4815_v33, %v5270_v48 }
 0x194   : > { %v3326_v23 = vpop.f32.mrb[0].mxu0 }
 0x195   : > { %v3940_v43 = vadd.f32 %v3326_v23, %v4798_v20  ;;  %v1340_v46 = vpop.f32.mrb[1].mxu0 }
 0x196   : > { %v3941_v62 = vadd.f32 %v4798_v20, %v1340_v46 }
 0x197   : > { %v1435_v8 = vmax.f32 %v3940_v43, 0.0  ;;  %v4843_v43 = vpack.c.bf16 %v1754_v44, %v1747_v32 }
 0x198   : > { %v1434_v53 = vmax.f32 %v3941_v62, 0.0  ;;  %v3329_v11 = vpop.f32.mrb[2].mxu0  ;;  %v4852_v62 = vpack.c.bf16 %v1768_v25, %v1761_v5 }
 0x199   : > { %v4832_v22 = vand.u32 4294901760, %v1435_v8  ;;  %v3942_v42 = vadd.f32 %v3329_v11, %v4798_v20  ;;  %v1352_v23 = vpop.f32.mrb[3].mxu0 }
 0x19a   : > { %v4835_v45 = vand.u32 4294901760, %v1434_v53  ;;  %v3943_v39 = vadd.f32 %v4798_v20, %v1352_v23  ;;  %v4874_v23 = vsub.f32 %v4560_v2, %v1507_v29  ;;  %v1782_v2 = vand.u32 4294901760, %v1781_v19 }
 0x19b   : > { %v4841_v3 = vsub.f32 %v1435_v8, %v4832_v22  ;;  %v1437_v28 = vmax.f32 %v3942_v42, 0.0 }
 0x19c   : > { %v4849_v24 = vsub.f32 %v1434_v53, %v4835_v45  ;;  %v1436_v11 = vmax.f32 %v3943_v39, 0.0  ;;  %v3332_v46 = vpop.f32.mrb[4].mxu0  ;;  %3660 = vmatprep.mubr.f32.mxu0 %v4835_v45  ;;  %v4865_v53 = vsub.f32 %v4555_v21, %v1504_v27  ;;  %v1775_v27 = vand.u32 4294901760, %v1774_v31 }
 0x19d   : > { %v4857_v55 = vand.u32 4294901760, %v1437_v28  ;;  %v3944_v8 = vadd.f32 %v3332_v46, %v4798_v20  ;;  %v1364_v32 = vpop.f32.mrb[5].mxu0  ;;  %3661 = vmatmul.mubr.f32.vlgmr.msra.gmra.mrb[16].mxu0 %v4832_v22  ;;  %v5274_v44 = vand.u32 4294901760, %v4841_v3 }
 0x19e   : > { %v4867_v25 = vand.u32 4294901760, %v1436_v11  ;;  %v3945_v5 = vadd.f32 %v4798_v20, %v1364_v32  ;;  %v5277_v42 = vand.u32 4294901760, %v4849_v24 }
 0x19f   : > { %v4877_v39 = vsub.f32 %v1437_v28, %v4857_v55  ;;  %v1439_v46 = vmax.f32 %v3944_v8, 0.0  ;;  %v1567_v21 = vsub.f32 %v4841_v3, %v5274_v44 }
 0x1a0   : > { %v4883_v15 = vsub.f32 %v1436_v11, %v4867_v25  ;;  %v1438_v32 = vmax.f32 %v3945_v5, 0.0  ;;  %v3335_v48 = vpop.f32.mrb[6].mxu0  ;;  %3663 = vmatprep.mubr.f32.mxu0 %v4867_v25  ;;  %v1557_v29 = vsub.f32 %v4849_v24, %v5277_v42 }
 0x1a1   : > { %v4889_v28 = vand.u32 4294901760, %v1439_v46  ;;  %v3946_v8 = vadd.f32 %v3335_v48, %v4798_v20  ;;  %v1376_v10 = vpop.f32.mrb[7].mxu0  ;;  %3664 = vmatmul.mubr.f32.gmra.mrb[18].mxu0 %v4857_v55  ;;  %v5280_v31 = vand.u32 4294901760, %v4877_v39  ;;  %v1568_v61 = vand.u32 4294901760, %v1567_v21 }
 0x1a2   : > { %v4895_v5 = vand.u32 4294901760, %v1438_v32  ;;  %v3947_v40 = vadd.f32 %v4798_v20, %v1376_v10  ;;  %v1558_v0 = vand.u32 4294901760, %v1557_v29  ;;  %v5281_v44 = vand.u32 4294901760, %v4883_v15 }
 0x1a3   : > { %v4900_v19 = vsub.f32 %v1439_v46, %v4889_v28  ;;  %v1441_v36 = vmax.f32 %v3946_v8, 0.0  ;;  %v1587_v48 = vsub.f32 %v4877_v39, %v5280_v31 }
 0x1a4   : > { %v4906_v42 = vsub.f32 %v1438_v32, %v4895_v5  ;;  %v1440_v30 = vmax.f32 %v3947_v40, 0.0  ;;  %v3338_v18 = vpop.f32.mrb[8].mxu0  ;;  %3380 = vmatprep.mubr.f32.mxu1 %v1558_v0  ;;  %3666 = vmatprep.mubr.f32.mxu0 %v4895_v5  ;;  %v1577_v10 = vsub.f32 %v4883_v15, %v5281_v44  ;;  %v4918_v32 = vpack.c.bf16 %v1782_v2, %v1775_v27 }
 0x1a5   : > { %v4913_v29 = vand.u32 4294901760, %v1441_v36  ;;  %v3948_v21 = vadd.f32 %v3338_v18, %v4798_v20  ;;  %v1388_v8 = vpop.f32.mrb[9].mxu0  ;;  %3381 = vmatmul.mubr.f32.vlgmr.msra.gmra.mrb[0].mxu1 %v1568_v61  ;;  %3667 = vmatmul.mubr.f32.gmra.mrb[20].mxu0 %v4889_v28  ;;  %v5284_v40 = vand.u32 4294901760, %v4900_v19  ;;  %v1588_v61 = vand.u32 4294901760, %v1587_v48 }
 0x1a6   : > { %v4920_v0 = vand.u32 4294901760, %v1440_v30  ;;  %v3949_v31 = vadd.f32 %v4798_v20, %v1388_v8  ;;  %3767 = vmatpush3.bf16.msra.mxu1 %v4716_v4  ;;  %v1578_v44 = vand.u32 4294901760, %v1577_v10  ;;  %v5285_v46 = vand.u32 4294901760, %v4906_v42 }
 0x1a7   : > { %v4926_v11 = vsub.f32 %v1441_v36, %v4913_v29  ;;  %v1443_v18 = vmax.f32 %v3948_v21, 0.0  ;;  %3769 = vmatprep.subr.bf16.mxu1 %v4838_v49  ;;  %v1607_v27 = vsub.f32 %v4900_v19, %v5284_v40  ;;  %v5334_v36 = vand.u32 4294901760, %v4865_v53 }
 0x1a8   : > { %v4933_v2 = vsub.f32 %v1440_v30, %v4920_v0  ;;  %v1442_v8 = vmax.f32 %v3949_v31, 0.0  ;;  %v3341_v57 = vpop.f32.mrb[10].mxu0  ;;  %3383 = vmatprep.mubr.f32.mxu1 %v1578_v44  ;;  %v1597_v4 = vsub.f32 %v4906_v42, %v5285_v46  ;;  %v5335_v31 = vand.u32 4294901760, %v4874_v23 }
 0x1a9   : > { %v1788_v10 = vsub.f32 %v4865_v53, %v5334_v36  ;;  %v4941_v21 = vand.u32 4294901760, %v1443_v18  ;;  %v3950_v48 = vadd.f32 %v3341_v57, %v4798_v20  ;;  %v1400_v38 = vpop.f32.mrb[11].mxu0  ;;  %3384 = vmatmul.mubr.f32.gmra.mrb[2].mxu1 %v1588_v61  ;;  %v5292_v30 = vand.u32 4294901760, %v4926_v11 }
 0x1aa   : > { %v1795_v44 = vsub.f32 %v4874_v23, %v5335_v31  ;;  %v4948_v40 = vand.u32 4294901760, %v1442_v8  ;;  %v3951_v46 = vadd.f32 %v4798_v20, %v1400_v38  ;;  %3771 = vmatpush3.bf16.msra.mxu1 %v4838_v49  ;;  %v1598_v14 = vand.u32 4294901760, %v1597_v4 }
 0x1ab   : > { %v5295_v36 = vand.u32 4294901760, %v4933_v2  ;;  %v4954_v7 = vsub.f32 %v1443_v18, %v4941_v21  ;;  %v1445_v57 = vmax.f32 %v3950_v48, 0.0  ;;  %3773 = vmatprep.subr.bf16.mxu1 %v4843_v43  ;;  %v1608_v61 = vand.u32 4294901760, %v1607_v27 }
 0x1ac   : > { %v1627_v31 = vsub.f32 %v4926_v11, %v5292_v30  ;;  %v4961_v1 = vsub.f32 %v1442_v8, %v4948_v40  ;;  %v1444_v38 = vmax.f32 %v3951_v46, 0.0  ;;  %v3344_v63 = vpop.f32.mrb[12].mxu0  ;;  %3386 = vmatprep.mubr.f32.mxu1 %v1598_v14  ;;  %v1789_v18 = vand.u32 4294901760, %v1788_v10 }
 0x1ad   : > { %5336 = vst [vmem:[#allocation12_spill] sm:$0xff] %v4954_v7  ;;  %v1617_v49 = vsub.f32 %v4933_v2, %v5295_v36  ;;  %v4966_v4 = vand.u32 4294901760, %v1445_v57  ;;  %v3952_v48 = vadd.f32 %v3344_v63, %v4798_v20  ;;  %v1412_v27 = vpop.f32.mrb[13].mxu0  ;;  %3387 = vmatmul.mubr.f32.gmra.mrb[4].mxu1 %v1608_v61  ;;  %v5300_v60 = vand.u32 4294901760, %v4954_v7 }
 0x1ae   : > { %v1796_v30 = vand.u32 4294901760, %v1795_v44  ;;  %v4970_v37 = vand.u32 4294901760, %v1444_v38  ;;  %v3953_v46 = vadd.f32 %v4798_v20, %v1412_v27  ;;  %3775 = vmatpush3.bf16.msra.mxu1 %v4843_v43  ;;  %v5301_v8 = vand.u32 4294901760, %v4961_v1 }
 0x1af   : > { %v1618_v14 = vand.u32 4294901760, %v1617_v49  ;;  %v4976_v10 = vsub.f32 %v1445_v57, %v4966_v4  ;;  %v1447_v36 = vmax.f32 %v3952_v48, 0.0  ;;  %3777 = vmatprep.subr.bf16.mxu1 %v4852_v62  ;;  %v1628_v63 = vand.u32 4294901760, %v1627_v31 }
 0x1b0   : > { %v1647_v44 = vsub.f32 %v4954_v7, %v5300_v60  ;;  %v4983_v61 = vsub.f32 %v1444_v38, %v4970_v37  ;;  %v1446_v27 = vmax.f32 %v3953_v46, 0.0  ;;  %v3347_v6 = vpop.f32.mrb[14].mxu0  ;;  %v1637_v43 = vsub.f32 %v4961_v1, %v5301_v8 }
 0x1b1   : > { %3389 = vmatprep.mubr.f32.mxu1 %v1618_v14  ;;  %v4988_v57 = vand.u32 4294901760, %v1447_v36  ;;  %v3954_v49 = vadd.f32 %v3347_v6, %v4798_v20  ;;  %v1424_v48 = vpop.f32.mrb[15].mxu0  ;;  %v3784_v31 = vpack.c.bf16 %v1796_v30, %v1789_v18  ;;  %v1666_v16 = vand.u32 4294901760, %v4976_v10 }
 0x1b2   : > { %3390 = vmatmul.mubr.f32.gmra.mrb[6].mxu1 %v1628_v63  ;;  %v4992_v60 = vand.u32 4294901760, %v1446_v27  ;;  %v3955_v38 = vadd.f32 %v4798_v20, %v1424_v48  ;;  %v1638_v46 = vand.u32 4294901760, %v1637_v43  ;;  %v1656_v14 = vand.u32 4294901760, %v4983_v61 }
 0x1b3   : > { %3779 = vmatpush3.bf16.msra.mxu1 %v4852_v62  ;;  %v4998_v8 = vsub.f32 %v1447_v36, %v4988_v57  ;;  %v1449_v7 = vmax.f32 %v3954_v49, 0.0  ;;  %v1648_v6 = vand.u32 4294901760, %v1647_v44  ;;  %v1667_v30 = vsub.f32 %v4976_v10, %v1666_v16 }
 0x1b4   : > { %3781 = vmatprep.subr.bf16.mxu1 %v4918_v32  ;;  %v5005_v18 = vsub.f32 %v1446_v27, %v4992_v60  ;;  %v1448_v20 = vmax.f32 %v3955_v38, 0.0  ;;  %3392 = vmatprep.mubr.f32.mxu1 %v1638_v46  ;;  %v1657_v62 = vsub.f32 %v4983_v61, %v1656_v14 }
 0x1b5   : > { %v5010_v63 = vand.u32 4294901760, %v1449_v7  ;;  %v1686_v36 = vand.u32 4294901760, %v4998_v8  ;;  %v1668_v48 = vand.u32 4294901760, %v1667_v30 }
 0x1b6   : > { %3393 = vmatmul.mubr.f32.gmra.mrb[8].mxu1 %v1648_v6  ;;  %v5013_v43 = vand.u32 4294901760, %v1448_v20  ;;  %v1658_v44 = vand.u32 4294901760, %v1657_v62  ;;  %v1676_v49 = vand.u32 4294901760, %v5005_v18 }
 0x1b7   : > { %3783 = vmatpush3.bf16.msra.mxu1 %v4918_v32  ;;  %v5018_v27 = vsub.f32 %v1449_v7, %v5010_v63  ;;  %v1687_v38 = vsub.f32 %v4998_v8, %v1686_v36 }
 0x1b8   : > { %3785 = vmatprep.subr.bf16.mxu1 %v3784_v31  ;;  %v5024_v46 = vsub.f32 %v1448_v20, %v5013_v43  ;;  %3395 = vmatprep.mubr.f32.mxu1 %v1658_v44  ;;  %v1677_v32 = vsub.f32 %v5005_v18, %v1676_v49 }
 0x1b9   : > { %v5304_v6 = vand.u32 4294901760, %v5018_v27  ;;  %v1688_v30 = vand.u32 4294901760, %v1687_v38  ;;  %v3800_v38 = vpack.c.bf16 %v4767_v12, %v4762_v56 }
 0x1ba   : > { %3396 = vmatmul.mubr.f32.gmra.mrb[10].mxu1 %v1668_v48  ;;  %v1678_v7 = vand.u32 4294901760, %v1677_v32  ;;  %v5305_v62 = vand.u32 4294901760, %v5024_v46  ;;  %v3816_v32 = vpack.c.bf16 %v4874_v23, %v4865_v53 }
 0x1bb   : > { %3787 = vmatpush3.bf16.msra.mxu1 %v3784_v31  ;;  %v1707_v20 = vsub.f32 %v5018_v27, %v5304_v6 }
 0x1bc   : > { %3789 = vmatprep.subr.bf16.mxu1 %v4737_v13  ;;  %3398 = vmatprep.mubr.f32.mxu1 %v1678_v7  ;;  %v1697_v44 = vsub.f32 %v5024_v46, %v5305_v62  ;;  %v5339_v7 = vld [vmem:[#allocation3_spill] sm:$0xff]  ;;  %v5349_v62 = vand.u32 4294901760, %v4841_v3 }
 0x1bd   : > { %v1708_v31 = vand.u32 4294901760, %v1707_v20  ;;  %v5341_v20 = vld [vmem:[#allocation5_spill] sm:$0xff] }
 0x1be   : > { %3399 = vmatmul.mubr.f32.gmra.mrb[12].mxu1 %v1688_v30  ;;  %v1698_v48 = vand.u32 4294901760, %v1697_v44  ;;  %v5340_v30 = vld [vmem:[#allocation4_spill] sm:$0xff]  ;;  %v5342_v44 = vld [vmem:[#allocation6_spill] sm:$0xff] }
 0x1bf   : > { %3791 = vmatpush3.bf16.msra.mxu1 %v4737_v13  ;;  %v3804_v13 = vpack.c.bf16 %v4777_v47, %v4772_v35 }
 0x1c0   : > { %3793 = vmatprep.subr.bf16.mxu1 %v4745_v50  ;;  %3401 = vmatprep.mubr.f32.mxu1 %v1698_v48  ;;  %v5343_v48 = vand.u32 4294901760, %v5342_v44  ;;  %v5350_v44 = vand.u32 4294901760, %v4883_v15 }
 0x1c2   : > { %3402 = vmatmul.mubr.f32.gmra.mrb[14].mxu1 %v1708_v31  ;;  %v5344_v31 = vld [vmem:[#allocation7_spill] sm:$0xff] }
 0x1c3   : > { %3795 = vmatpush3.bf16.msra.mxu1 %v4745_v50  ;;  %3436 = vmatprep.mubr.f32.mxu1 %v4835_v45  ;;  %v3808_v50 = vpack.c.bf16 %v4787_v17, %v4782_v26 }
 0x1c4   : > { %3797 = vmatprep.subr.bf16.mxu1 %v4749_v51 }
 0x1c6   : > { %3437 = vmatmul.mubr.f32.vlgmr.msra.gmra.mrb[0].mxu1 %v4832_v22 }
 0x1c7   : > { %3799 = vmatpush3.bf16.msra.mxu1 %v4749_v51  ;;  %3439 = vmatprep.mubr.f32.mxu1 %v4867_v25  ;;  %v3812_v51 = vpack.c.bf16 %v4826_v41, %v4815_v33 }
 0x1c8   : > { %3801 = vmatprep.subr.bf16.mxu1 %v3800_v38 }
 0x1ca   : > { %3440 = vmatmul.mubr.f32.gmra.mrb[2].mxu1 %v4857_v55 }
 0x1cb   : > { %3803 = vmatpush3.bf16.msra.mxu1 %v3800_v38  ;;  %3442 = vmatprep.mubr.f32.mxu1 %v4895_v5  ;;  %v5345_v38 = vand.u32 4294901760, %v5344_v31  ;;  %v5352_v31 = vand.u32 4294901760, %v4777_v47  ;;  %v5359_v47 = vand.u32 4294901760, %v4815_v33  ;;  %v5366_v33 = vld [vmem:[#allocation8_spill] sm:$0xff] }
 0x1cc   : > { %3805 = vmatprep.subr.bf16.mxu1 %v3804_v13 }
 0x1ce   : > { %3443 = vmatmul.mubr.f32.gmra.mrb[4].mxu1 %v4889_v28 }
 0x1cf   : > { %3807 = vmatpush3.bf16.msra.mxu1 %v3804_v13  ;;  %3445 = vmatprep.mubr.f32.mxu1 %v4920_v0  ;;  %v3860_v13 = vpack.c.bf16 %v5345_v38, %v5343_v48  ;;  %v5351_v48 = vand.u32 4294901760, %v4772_v35  ;;  %v5353_v38 = vand.u32 4294901760, %v4877_v39  ;;  %v5358_v35 = vand.u32 4294901760, %v4933_v2 }
 0x1d0   : > { %3809 = vmatprep.subr.bf16.mxu1 %v3808_v50 }
 0x1d2   : > { %3446 = vmatmul.mubr.f32.gmra.mrb[6].mxu1 %v4913_v29 }
 0x1d3   : > { %3811 = vmatpush3.bf16.msra.mxu1 %v3808_v50  ;;  %3448 = vmatprep.mubr.f32.mxu1 %v4948_v40  ;;  %v5346_v50 = vand.u32 4294901760, %v4849_v24 }
 0x1d4   : > { %3813 = vmatprep.subr.bf16.mxu1 %v3812_v51 }
 0x1d6   : > { %3449 = vmatmul.mubr.f32.gmra.mrb[8].mxu1 %v4941_v21 }
 0x1d7   : > { %3815 = vmatpush3.bf16.msra.mxu1 %v3812_v51  ;;  %3451 = vmatprep.mubr.f32.mxu1 %v4970_v37  ;;  %v5347_v51 = vand.u32 4294901760, %v4762_v56  ;;  %v5354_v56 = vand.u32 4294901760, %v4906_v42 }
 0x1d8   : > { %3817 = vmatprep.subr.bf16.mxu1 %v3816_v32 }
 0x1da   : > { %3452 = vmatmul.mubr.f32.gmra.mrb[10].mxu1 %v4966_v4 }
 0x1db   : > { %3819 = vmatpush3.bf16.msra.mxu1 %v3816_v32  ;;  %3454 = vmatprep.mubr.f32.mxu1 %v4992_v60  ;;  %v5348_v32 = vand.u32 4294901760, %v4767_v12  ;;  %v5355_v12 = vand.u32 4294901760, %v4782_v26  ;;  %v5362_v26 = vand.u32 4294901760, %v4961_v1 }
 0x1dc   : > { %3821 = vmatprep.subr.bf16.mxu1 %v4753_v52 }
 0x1dd   : > { %v3864_v6 = vpack.c.bf16 %v5348_v32, %v5347_v51 }
 0x1de   : > { %3455 = vmatmul.mubr.f32.gmra.mrb[12].mxu1 %v4988_v57 }
 0x1df   : > { %3823 = vmatpush3.bf16.msra.mxu1 %v4753_v52  ;;  %3457 = vmatprep.mubr.f32.mxu1 %v5013_v43  ;;  %v5337_v52 = vld [vmem:[#allocation2_spill] sm:$0xff] }
 0x1e0   : > { %3825 = vmatprep.subr.bf16.mxu1 %v4757_v54 }
 0x1e2   : > { %3458 = vmatmul.mubr.f32.gmra.mrb[14].mxu1 %v5010_v63 }
 0x1e3   : > { %3827 = vmatpush3.bf16.msra.mxu1 %v4757_v54  ;;  %3492 = vmatprep.mubr.f32.mxu1 %v4849_v24  ;;  %v5338_v54 = vld [vmem:[#allocation12_spill] sm:$0xff]  ;;  %v3868_v24 = vpack.c.bf16 %v5352_v31, %v5351_v48 }
 0x1e4   : > { %3829 = vmatprep.subr.bf16.mxu1 %v4491_v58 }
 0x1e6   : > { %3493 = vmatmul.mubr.f32.vlgmr.msra.gmra.mrb[0].mxu1 %v4841_v3  ;;  %v5356_v3 = vand.u32 4294901760, %v4787_v17  ;;  %v5363_v17 = vand.u32 4294901760, %v4865_v53  ;;  %v5370_v53 = vld [vmem:[#allocation10_spill] sm:$0xff] }
 0x1e7   : > { %3831 = vmatpush3.bf16.msra.mxu1 %v4491_v58  ;;  %3495 = vmatprep.mubr.f32.mxu1 %v4883_v15 }
 0x1e8   : > { %3833 = vmatprep.subr.bf16.mxu1 %v4500_v59  ;;  %v3872_v15 = vpack.c.bf16 %v5356_v3, %v5355_v12 }
 0x1ea   : > { %3496 = vmatmul.mubr.f32.gmra.mrb[2].mxu1 %v4877_v39  ;;  %v5360_v39 = vand.u32 4294901760, %v4826_v41  ;;  %v5367_v41 = vand.u32 4294901760, %v5366_v33 }
 0x1eb   : > { %3835 = vmatpush3.bf16.msra.mxu1 %v4500_v59  ;;  %3498 = vmatprep.mubr.f32.mxu1 %v4906_v42 }
 0x1ec   : > { %3837 = vmatprep.subr.bf16.mxu1 %v4525_v34  ;;  %v3876_v42 = vpack.c.bf16 %v5360_v39, %v5359_v47 }
 0x1ee   : > { %3499 = vmatmul.mubr.f32.gmra.mrb[4].mxu1 %v4900_v19 }
 0x1ef   : > { %3839 = vmatpush3.bf16.msra.mxu1 %v4525_v34  ;;  %3501 = vmatprep.mubr.f32.mxu1 %v4933_v2 }
 0x1f0   : > { %3841 = vmatprep.subr.bf16.mxu1 %v4547_v9 }
 0x1f2   : > { %3502 = vmatmul.mubr.f32.gmra.mrb[6].mxu1 %v4926_v11 }
 0x1f3   : > { %3843 = vmatpush3.bf16.msra.mxu1 %v4547_v9  ;;  %3504 = vmatprep.mubr.f32.mxu1 %v4961_v1 }
 0x1f4   : > { %3845 = vmatprep.subr.bf16.mxu1 %v5337_v52 }
 0x1f6   : > { %3505 = vmatmul.mubr.f32.gmra.mrb[8].mxu1 %v5338_v54 }
 0x1f7   : > { %3847 = vmatpush3.bf16.msra.mxu1 %v5337_v52  ;;  %3507 = vmatprep.mubr.f32.mxu1 %v4983_v61 }
 0x1f8   : > { %3849 = vmatprep.subr.bf16.mxu1 %v5339_v7 }
 0x1fa   : > { %3508 = vmatmul.mubr.f32.gmra.mrb[10].mxu1 %v4976_v10 }
 0x1fb   : > { %3851 = vmatpush3.bf16.msra.mxu1 %v5339_v7  ;;  %3510 = vmatprep.mubr.f32.mxu1 %v5005_v18 }
 0x1fc   : > { %3853 = vmatprep.subr.bf16.mxu1 %v5340_v30 }
 0x1fe   : > { %3511 = vmatmul.mubr.f32.gmra.mrb[12].mxu1 %v4998_v8 }
 0x1ff   : > { %3855 = vmatpush3.bf16.msra.mxu1 %v5340_v30  ;;  %3513 = vmatprep.mubr.f32.mxu1 %v5024_v46 }
 0x200   : > { %3857 = vmatprep.subr.bf16.mxu1 %v5341_v20 }
 0x202   : > { %3514 = vmatmul.mubr.f32.gmra.mrb[14].mxu1 %v5018_v27 }
 0x203   : > { %3859 = vmatpush3.bf16.msra.mxu1 %v5341_v20  ;;  %3548 = vmatprep.mubr.f32.mxu1 %v5346_v50 }
 0x204   : > { %3861 = vmatprep.subr.bf16.mxu1 %v3860_v13 }
 0x206   : > { %3549 = vmatmul.mubr.f32.vlgmr.msra.gmra.mrb[0].mxu1 %v5349_v62  ;;  %v5357_v62 = vand.u32 4294901760, %v4900_v19  ;;  %v5364_v19 = vand.u32 4294901760, %v4874_v23  ;;  %v5371_v23 = vand.u32 4294901760, %v5370_v53 }
 0x207   : > { %3863 = vmatpush3.bf16.msra.mxu1 %v3860_v13  ;;  %3551 = vmatprep.mubr.f32.mxu1 %v5350_v44  ;;  %v5365_v13 = vand.u32 4294901760, %v5338_v54  ;;  %v5372_v54 = vld [vmem:[#allocation11_spill] sm:$0xff] }
 0x208   : > { %3865 = vmatprep.subr.bf16.mxu1 %v3864_v6  ;;  %v3880_v2 = vpack.c.bf16 %v5364_v19, %v5363_v17  ;;  %v5373_v51 = vand.u32 4294901760, %v5372_v54 }
 0x20a   : > { %3552 = vmatmul.mubr.f32.gmra.mrb[2].mxu1 %v5353_v38  ;;  %v3888_v61 = vpack.c.bf16 %v5373_v51, %v5371_v23 }
 0x20b   : > { %3867 = vmatpush3.bf16.msra.mxu1 %v3864_v6  ;;  %3554 = vmatprep.mubr.f32.mxu1 %v5354_v56  ;;  %v5361_v6 = vand.u32 4294901760, %v4926_v11  ;;  %v5368_v11 = vld [vmem:[#allocation9_spill] sm:$0xff] }
 0x20c   : > { %3869 = vmatprep.subr.bf16.mxu1 %v3868_v24  ;;  %v5369_v50 = vand.u32 4294901760, %v5368_v11 }
 0x20e   : > { %3555 = vmatmul.mubr.f32.gmra.mrb[4].mxu1 %v5357_v62  ;;  %v3884_v1 = vpack.c.bf16 %v5369_v50, %v5367_v41 }
 0x20f   : > { %3871 = vmatpush3.bf16.msra.mxu1 %v3868_v24  ;;  %3557 = vmatprep.mubr.f32.mxu1 %v5358_v35 }
 0x210   : > { %3873 = vmatprep.subr.bf16.mxu1 %v3872_v15 }
 0x212   : > { %3558 = vmatmul.mubr.f32.gmra.mrb[6].mxu1 %v5361_v6 }
 0x213   : > { %3875 = vmatpush3.bf16.msra.mxu1 %v3872_v15  ;;  %3560 = vmatprep.mubr.f32.mxu1 %v5362_v26 }
 0x214   : > { %3877 = vmatprep.subr.bf16.mxu1 %v3876_v42 }
 0x216   : > { %3561 = vmatmul.mubr.f32.gmra.mrb[8].mxu1 %v5365_v13 }
 0x217   : > { %3879 = vmatpush3.bf16.msra.mxu1 %v3876_v42  ;;  %3563 = vmatprep.mubr.f32.mxu1 %v1656_v14  ;;  %v5374_v14 = vand.u32 4294901760, %v5024_v46 }
 0x218   : > { %3881 = vmatprep.subr.bf16.mxu1 %v3880_v2 }
 0x21a   : > { %3564 = vmatmul.mubr.f32.gmra.mrb[10].mxu1 %v1666_v16  ;;  %v5375_v16 = vand.u32 4294901760, %v5018_v27 }
 0x21b   : > { %3883 = vmatpush3.bf16.msra.mxu1 %v3880_v2  ;;  %3566 = vmatprep.mubr.f32.mxu1 %v1676_v49 }
 0x21c   : > { %3885 = vmatprep.subr.bf16.mxu1 %v3884_v1 }
 0x21e   : > { %3567 = vmatmul.mubr.f32.gmra.mrb[12].mxu1 %v1686_v36 }
 0x21f   : > { %3887 = vmatpush3.bf16.msra.mxu1 %v3884_v1  ;;  %3569 = vmatprep.mubr.f32.mxu1 %v5374_v14 }
 0x220   : > { %3889 = vmatprep.subr.bf16.mxu1 %v3888_v61 }
 0x222   : > { %3570 = vmatmul.mubr.f32.gmra.mrb[14].mxu1 %v5375_v16 }
 0x223   : > { %3891 = vmatpush3.bf16.msra.mxu1 %v3888_v61  ;;  %3604 = vmatprep.mubr.f32.mxu1 %v4835_v45 }
 0x224   : > { %3924 = vmatprep.subr.bf16.mxu1 %v4491_v58 }
 0x226   : > { %3605 = vmatmul.mubr.f32.vlgmr.msra.gmra.mrb[0].mxu1 %v4832_v22 }
 0x227   : > { %3932 = vmatpush3.bf16.msra.mxu1 %v4491_v58  ;;  %3607 = vmatprep.mubr.f32.mxu1 %v4867_v25 }
 0x228   : > { %3925 = vmatprep.subr.bf16.mxu1 %v4500_v59 }
 0x22a   : > { %3608 = vmatmul.mubr.f32.gmra.mrb[2].mxu1 %v4857_v55 }
 0x22b   : > { %3933 = vmatpush3.bf16.msra.mxu1 %v4500_v59  ;;  %3610 = vmatprep.mubr.f32.mxu1 %v4895_v5 }
 0x22c   : > { %3926 = vmatprep.subr.bf16.mxu1 %v4525_v34 }
 0x22e   : > { %3611 = vmatmul.mubr.f32.gmra.mrb[4].mxu1 %v4889_v28 }
 0x22f   : > { %3934 = vmatpush3.bf16.msra.mxu1 %v4525_v34  ;;  %3613 = vmatprep.mubr.f32.mxu1 %v4920_v0 }
 0x230   : > { %3927 = vmatprep.subr.bf16.mxu1 %v4547_v9 }
 0x232   : > { %3614 = vmatmul.mubr.f32.gmra.mrb[6].mxu1 %v4913_v29 }
 0x233   : > { %3935 = vmatpush3.bf16.msra.mxu1 %v4547_v9  ;;  %3616 = vmatprep.mubr.f32.mxu1 %v4948_v40 }
 0x234   : > { %3928 = vmatprep.subr.bf16.mxu1 %v5337_v52 }
 0x236   : > { %3617 = vmatmul.mubr.f32.gmra.mrb[8].mxu1 %v4941_v21 }
 0x237   : > { %3936 = vmatpush3.bf16.msra.mxu1 %v5337_v52  ;;  %3619 = vmatprep.mubr.f32.mxu1 %v4970_v37 }
 0x238   : > { %3929 = vmatprep.subr.bf16.mxu1 %v5339_v7 }
 0x23a   : > { %3620 = vmatmul.mubr.f32.gmra.mrb[10].mxu1 %v4966_v4 }
 0x23b   : > { %3937 = vmatpush3.bf16.msra.mxu1 %v5339_v7  ;;  %3622 = vmatprep.mubr.f32.mxu1 %v4992_v60 }
 0x23c   : > { %3930 = vmatprep.subr.bf16.mxu1 %v5340_v30 }
 0x23e   : > { %3623 = vmatmul.mubr.f32.gmra.mrb[12].mxu1 %v4988_v57 }
 0x23f   : > { %3938 = vmatpush3.bf16.msra.mxu1 %v5340_v30  ;;  %3625 = vmatprep.mubr.f32.mxu1 %v5013_v43 }
 0x240   : > { %3931 = vmatprep.subr.bf16.mxu1 %v5341_v20 }
 0x242   : > { %3626 = vmatmul.mubr.f32.gmra.mrb[14].mxu1 %v5010_v63 }
 0x243   : > { %3939 = vmatpush3.bf16.msra.mxu1 %v5341_v20  ;;  %3669 = vmatprep.mubr.f32.mxu1 %v4920_v0 }
 0x246   : > { %3670 = vmatmul.mubr.f32.vlgmr.msra.gmra.mrb[6].mxu1 %v4913_v29 }
 0x247   : > { %3672 = vmatprep.mubr.f32.mxu1 %v4948_v40 }
 0x24a   : > { %3673 = vmatmul.mubr.f32.gmra.mrb[8].mxu1 %v4941_v21 }
 0x24b   : > { %3675 = vmatprep.mubr.f32.mxu1 %v4970_v37  ;;  %v2841_v37 = vld [vmem:[%s5244_s4] ss:$0 sm:$0xff] }
 0x24e   : > { %3676 = vmatmul.mubr.f32.gmra.mrb[10].mxu1 %v4966_v4 }
 0x24f   : > { %3678 = vmatprep.mubr.f32.mxu1 %v4992_v60 }
 0x252   : > { %3679 = vmatmul.mubr.f32.gmra.mrb[12].mxu1 %v4988_v57 }
 0x253   : > { %3681 = vmatprep.mubr.f32.mxu1 %v5013_v43 }
 0x256   : > { %3682 = vmatmul.mubr.f32.gmra.mrb[14].mxu1 %v5010_v63 }
 0x270   : > { %v3662_v9 = vpop.f32.mrb[16].mxu0 }
 0x271   : > { %v2665_v34 = vpop.f32.mrb[17].mxu0 }
 0x274   : > { %v3665_v58 = vpop.f32.mrb[18].mxu0 }
 0x275   : > { %v2677_v59 = vpop.f32.mrb[19].mxu0 }
 0x278   : > { %v3668_v45 = vpop.f32.mrb[20].mxu0 }
 0x279   : > { %v2689_v22 = vpop.f32.mrb[21].mxu0 }
 0x2f9   : > { %v3606_v55 = vpop.f32.mrb[0].mxu1 }
 0x2fa   : > { %v3956_v25 = vadd.f32 %v3606_v55, %v2841_v37  ;;  %v2488_v28 = vpop.f32.mrb[1].mxu1 }
 0x2fb   : > { %v3958_v60 = vadd.f32 %v2841_v37, %v2488_v28 }
 0x2fc   : > { %v3957_v5 = vadd.f32 %v3956_v25, %v3662_v9 }
 0x2fd   : > { %v3959_v29 = vadd.f32 %v3958_v60, %v2665_v34  ;;  %v3609_v40 = vpop.f32.mrb[2].mxu1 }
 0x2fe   : > { %2760 = vst [vmem:[%s5219_s25 + $0x8] sm:$0xff] %v3957_v5  ;;  %v3960_v0 = vadd.f32 %v3609_v40, %v2841_v37  ;;  %v2500_v21 = vpop.f32.mrb[3].mxu1 }
 0x2ff   : > { %2759 = vst [vmem:[%s5219_s25] sm:$0xff] %v3959_v29  ;;  %v3962_v4 = vadd.f32 %v2841_v37, %v2500_v21 }
 0x300   : > { %v3961_v8 = vadd.f32 %v3960_v0, %v3665_v58 }
 0x301   : > { %v3963_v10 = vadd.f32 %v3962_v4, %v2677_v59  ;;  %v3612_v57 = vpop.f32.mrb[4].mxu1 }
 0x302   : > { %2762 = vst [vmem:[%s5219_s25 + $0x18] sm:$0xff] %v3961_v8  ;;  %v3964_v18 = vadd.f32 %v3612_v57, %v2841_v37  ;;  %v2512_v63 = vpop.f32.mrb[5].mxu1 }
 0x303   : > { %2761 = vst [vmem:[%s5219_s25 + $0x10] sm:$0xff] %v3963_v10  ;;  %v3966_v36 = vadd.f32 %v2841_v37, %v2512_v63 }
 0x304   : > { %v3965_v43 = vadd.f32 %v3964_v18, %v3668_v45 }
 0x305   : > { %v3967_v49 = vadd.f32 %v3966_v36, %v2689_v22 }
 0x306   : > { %2764 = vst [vmem:[%s5219_s25 + $0x28] sm:$0xff] %v3965_v43 }
 0x307   : > { %2763 = vst [vmem:[%s5219_s25 + $0x20] sm:$0xff] %v3967_v49 }
 0x319   : > { %v3671_v27 = vpop.f32.mrb[6].mxu1 }
 0x31a   : > { %v3968_v46 = vadd.f32 %v3671_v27, %v2841_v37  ;;  %v2701_v52 = vpop.f32.mrb[7].mxu1 }
 0x31b   : > { %v3969_v7 = vadd.f32 %v2841_v37, %v2701_v52 }
 0x31c   : > { %2766 = vst [vmem:[%s5219_s25 + $0x38] sm:$0xff] %v3968_v46 }
 0x31d   : > { %2765 = vst [vmem:[%s5219_s25 + $0x30] sm:$0xff] %v3969_v7  ;;  %v3674_v30 = vpop.f32.mrb[8].mxu1 }
 0x31e   : > { %v3970_v20 = vadd.f32 %v3674_v30, %v2841_v37  ;;  %v2713_v32 = vpop.f32.mrb[9].mxu1 }
 0x31f   : > { %v3971_v44 = vadd.f32 %v2841_v37, %v2713_v32 }
 0x320   : > { %2768 = vst [vmem:[%s5219_s25 + $0x48] sm:$0xff] %v3970_v20 }
 0x321   : > { %2767 = vst [vmem:[%s5219_s25 + $0x40] sm:$0xff] %v3971_v44  ;;  %v3677_v48 = vpop.f32.mrb[10].mxu1 }
 0x322   : > { %v3972_v31 = vadd.f32 %v3677_v48, %v2841_v37  ;;  %v2725_v24 = vpop.f32.mrb[11].mxu1 }
 0x323   : > { %v3973_v38 = vadd.f32 %v2841_v37, %v2725_v24 }
 0x324   : > { %2770 = vst [vmem:[%s5219_s25 + $0x58] sm:$0xff] %v3972_v31 }
 0x325   : > { %2769 = vst [vmem:[%s5219_s25 + $0x50] sm:$0xff] %v3973_v38  ;;  %v3680_v56 = vpop.f32.mrb[12].mxu1 }
 0x326   : > { %v3974_v12 = vadd.f32 %v3680_v56, %v2841_v37  ;;  %v2737_v3 = vpop.f32.mrb[13].mxu1 }
 0x327   : > { %v3975_v15 = vadd.f32 %v2841_v37, %v2737_v3 }
 0x328   : > { %2772 = vst [vmem:[%s5219_s25 + $0x68] sm:$0xff] %v3974_v12 }
 0x329   : > { %2771 = vst [vmem:[%s5219_s25 + $0x60] sm:$0xff] %v3975_v15  ;;  %v3683_v62 = vpop.f32.mrb[14].mxu1 }
 0x32a   : > { %v3976_v35 = vadd.f32 %v3683_v62, %v2841_v37  ;;  %v2749_v47 = vpop.f32.mrb[15].mxu1 }
 0x32b   : > { %v3977_v39 = vadd.f32 %v2841_v37, %v2749_v47 }
 0x32c   : > { %2774 = vst [vmem:[%s5219_s25 + $0x78] sm:$0xff] %v3976_v35 }
 0x32d   : > { %2773 = vst [vmem:[%s5219_s25 + $0x70] sm:$0xff] %v3977_v39 }
 0x32e PF: > { %s15_s18 = sadd.s32 1, %s4146_s18  }
 0x32f   : > { %p12_p4 = scmp.ge.s32.totalorder %s15_s18, 4  }
 0x331   :  { %14 = sbr.rel (!%p12_p4) target bundleno = 1 (0x1), region = 70 }

</bundles_post_ra>
